<compile_context>
chip_gen: v6e
topology: v6e:2x2x1
jax: 0.10.0
libtpu: 0.0.40
codegen_flags: <defaults>
</compile_context>

<pallas_src>
import functools

import jax
import jax.numpy as jnp
from jax import lax
from jax.experimental import pallas as pl
from jax.experimental.pallas import tpu as pltpu


def _round_up(a, m):
    return (a + m - 1) // m * m


def _embed_kernel(x_ref, ct_ref, sqc_ref, o_ref, acc_ref, sqx_ref, *, distance):
    # x_ref:   (TM, TD)  activation tile (input dtype, fed straight to MXU)
    # ct_ref:  (TD, TN)  pre-transposed centroid tile (contraction on sublanes)
    # sqc_ref: (1, TN)   precomputed ||c||^2 (f32)
    # o_ref:   (TM, TN)  output tile
    # acc_ref: (TM, TN)  f32 matmul accumulator (persists across the D axis)
    # sqx_ref: (TM, 1)   f32 ||x||^2 accumulator (computed in-kernel)
    k = pl.program_id(3)

    @pl.when(k == 0)
    def _():
        acc_ref[...] = jnp.zeros_like(acc_ref)
        sqx_ref[...] = jnp.zeros_like(sqx_ref)

    x = x_ref[...]
    # Row squared norms: XLU lane-reduce, free filler under the tile DMA.
    xf = x.astype(jnp.float32)
    sqx_ref[...] += jnp.sum(xf * xf, axis=1, keepdims=True)

    # MXU: contract the D tile; centroids already [D, K] so no in-kernel
    # transpose/relayout of the RHS.
    acc_ref[...] += lax.dot_general(
        x, ct_ref[...],
        dimension_numbers=(((1,), (0,)), ((), ())),
        preferred_element_type=jnp.float32,
    )

    @pl.when(k == pl.num_programs(3) - 1)
    def _():
        xc = acc_ref[...]            # (TM, TN) f32
        sq_x = sqx_ref[...]          # (TM, 1)  f32
        sq_c = sqc_ref[...]          # (1, TN)  f32
        if distance == "euclidean":
            # ||x - c||^2 = ||x||^2 + ||c||^2 - 2 x.c  (clamped for fp safety)
            d2 = jnp.maximum(sq_x + sq_c - 2.0 * xc, 0.0)
            o_ref[...] = jnp.sqrt(d2).astype(o_ref.dtype)
        else:  # cosine
            # Factored reciprocals: TM+TN EUP ops per tile instead of TM*TN.
            eps = jnp.float32(1e-8)
            rnx = pl.reciprocal(jnp.maximum(jnp.sqrt(sq_x), eps))   # (TM, 1)
            rnc = pl.reciprocal(jnp.maximum(jnp.sqrt(sq_c), eps))   # (1, TN)
            o_ref[...] = (xc * (rnx * rnc)).astype(o_ref.dtype)


def embedder_forward(x, centroids, distance="euclidean", d_block=None):
    """x: [L, B, D], centroids: [L, K, D]  ->  [L, B, K]."""
    if distance not in ("euclidean", "cosine"):
        raise ValueError(f"unknown distance: {distance}")
    L, B, D = x.shape
    Lc, K, Dc = centroids.shape
    assert L == Lc and D == Dc

    in_isz = jnp.dtype(x.dtype).itemsize
    out_isz = in_isz

    # ---- generation-dependent VMEM budget --------------------------------
    try:
        vmem_cap = int(pltpu.get_tpu_info().vmem_capacity_bytes)
    except Exception:
        vmem_cap = 64 * 1024 * 1024
    budget = (vmem_cap * 3) // 4          # ~96 MiB v5e/v6e, ~48 MiB v7x
    big_vmem = budget >= (64 << 20)
    tm_cap = 512 if big_vmem else 256
    tn_cap = 1024 if big_vmem else 512

    # ---- tile selection ---------------------------------------------------
    # Batch tile: multiple of 8 and <= B (ragged edge block handles the rest),
    # or exactly B when B < 8 (block == full dim needs no 8-alignment).
    if B < 8:
        TM = B
    else:
        TM = min(tm_cap, (B // 8) * 8)
    # Centroid tile: lane-dense (multiple of 128); K padded up in the wrapper
    # so output stores are never masked.
    TN = _round_up(K, 128) if K <= tn_cap else tn_cap
    K_pad = _round_up(K, TN)

    def vmem_need(td):
        return (2 * (TM * td + td * TN) * in_isz     # double-buffered x / c tiles
                + 2 * TM * TN * out_isz              # double-buffered out tile
                + 2 * TN * 4                         # ||c||^2 tile
                + TM * TN * 4 + TM * 4)              # acc + ||x||^2 scratch

    # D tile: full-D blocks when they fit the budget, otherwise tile D in
    # multiples of 128 (only then is x padded along D, with zeros -> exact).
    if d_block is not None:
        TD = int(d_block)
        assert TD == D or TD % 128 == 0
    elif D <= 128 or vmem_need(D) <= budget:
        TD = D
    else:
        avail = budget - (2 * TM * TN * out_isz + 2 * TN * 4 + TM * TN * 4 + TM * 4)
        TD = max(128, (avail // (2 * (TM + TN) * in_isz)) // 128 * 128)
    D_pad = D if TD == D else _round_up(D, TD)

    grid_b = pl.cdiv(B, TM)
    grid_k = K_pad // TN
    grid_d = D_pad // TD

    # ---- one-time centroid prep (small operand, fully amortized) ----------
    c_p = centroids
    if K_pad != K or D_pad != D:
        c_p = jnp.pad(c_p, ((0, 0), (0, K_pad - K), (0, D_pad - D)))
    sq_c = jnp.sum(jnp.square(c_p.astype(jnp.float32)), axis=-1)[:, None, :]  # [L,1,Kp]
    c_t = jnp.swapaxes(c_p, 1, 2)                                             # [L,Dp,Kp]
    if D_pad != D:
        # Zero-pad of the contraction dim (only when D itself is tiled).
        x = jnp.pad(x, ((0, 0), (0, 0), (0, D_pad - D)))

    # ---- grid order: keep the higher-traffic operand resident -------------
    bytes_x = B * D_pad * in_isz
    bytes_c = K_pad * D_pad * in_isz
    x_outer = (grid_b * bytes_c + bytes_x) <= (grid_k * bytes_x + bytes_c)
    if x_outer:
        grid = (L, grid_b, grid_k, grid_d)      # x tile resident across K tiles
        x_map = lambda l, i, j, k: (l, i, k)
        c_map = lambda l, i, j, k: (l, k, j)
        sqc_map = lambda l, i, j, k: (l, 0, j)
        o_map = lambda l, i, j, k: (l, i, j)
    else:
        grid = (L, grid_k, grid_b, grid_d)      # centroid tile resident across B tiles
        x_map = lambda l, j, i, k: (l, i, k)
        c_map = lambda l, j, i, k: (l, k, j)
        sqc_map = lambda l, j, i, k: (l, 0, j)
        o_map = lambda l, j, i, k: (l, i, j)

    need = vmem_need(TD)
    vmem_limit = int(min(budget, max(need + (4 << 20), 16 << 20)))

    kernel = functools.partial(_embed_kernel, distance=distance)

    out = pl.pallas_call(
        kernel,
        out_shape=jax.ShapeDtypeStruct((L, B, K_pad), x.dtype),
        grid_spec=pltpu.PrefetchScalarGridSpec(
            num_scalar_prefetch=0,
            grid=grid,
            in_specs=[
                pl.BlockSpec((None, TM, TD), x_map),
                pl.BlockSpec((None, TD, TN), c_map),
                pl.BlockSpec((None, 1, TN), sqc_map),
            ],
            out_specs=pl.BlockSpec((None, TM, TN), o_map),
            scratch_shapes=[
                pltpu.VMEM((TM, TN), jnp.float32),   # matmul accumulator
                pltpu.VMEM((TM, 1), jnp.float32),    # in-kernel ||x||^2
            ],
        ),
        compiler_params=pltpu.CompilerParams(
            dimension_semantics=("parallel", "parallel", "parallel", "arbitrary"),
            vmem_limit_bytes=vmem_limit,
        ),
    )(x, c_t, sq_c)

    return out[:, :, :K] if K_pad != K else out


def _reference_forward(x, centroids, distance="euclidean"):
    """Pure-JAX reference matching the PyTorch semantics."""
    if distance == "euclidean":
        diff = x[:, :, None, :] - centroids[:, None, :, :]        # [L,B,K,D]
        return jnp.sqrt(jnp.sum(diff * diff, axis=-1))
    dot = jnp.einsum("lbd,lkd->lbk", x, centroids,
                     precision=lax.Precision.HIGHEST)
    eps = 1e-8
    nx = jnp.maximum(jnp.linalg.norm(x, axis=-1), eps)            # [L,B]
    nc = jnp.maximum(jnp.linalg.norm(centroids, axis=-1), eps)    # [L,K]
    return dot / (nx[:, :, None] * nc[:, None, :])


if __name__ == "__main__":
    key = jax.random.PRNGKey(0)
    kx, kc, kx2, kc2 = jax.random.split(key, 4)

    # Test 1: small shapes, full-D blocks, both distance metrics.
    L, B, K, D = 3, 8, 16, 32
    x = jax.random.normal(kx, (L, B, D), dtype=jnp.float32)
    c = jax.random.normal(kc, (L, K, D), dtype=jnp.float32)
    for dist in ("euclidean", "cosine"):
        out = jax.block_until_ready(embedder_forward(x, c, distance=dist))
        ref = _reference_forward(x, c, distance=dist)
        assert out.shape == (L, B, K)
        assert jnp.allclose(out, ref, rtol=1e-4, atol=1e-4), f"{dist} mismatch"

    # Test 2: ragged batch edge block (B not a multiple of the tile), padded K,
    # tiled D reduction (d_block=128), and the centroid-resident grid order.
    L2, B2, K2, D2 = 2, 44, 200, 256
    x2 = jax.random.normal(kx2, (L2, B2, D2), dtype=jnp.float32)
    c2 = jax.random.normal(kc2, (L2, K2, D2), dtype=jnp.float32)
    for dist in ("euclidean", "cosine"):
        out2 = jax.block_until_ready(
            embedder_forward(x2, c2, distance=dist, d_block=128))
        ref2 = _reference_forward(x2, c2, distance=dist)
        assert out2.shape == (L2, B2, K2)
        assert jnp.allclose(out2, ref2, rtol=1e-3, atol=1e-3), f"{dist} tiled mismatch"

    print("KERNEL_OK")
</pallas_src>

<mosaic_0001>
module attributes {stable_mosaic.version = 11 : i64} {
  func.func @_embed_kernel(%arg0: i32, %arg1: i32, %arg2: i32, %arg3: i32, %arg4: memref<1x8x32xf32, #tpu.memory_space<vmem>>, %arg5: memref<1x32x128xf32, #tpu.memory_space<vmem>>, %arg6: memref<1x1x128xf32, #tpu.memory_space<vmem>>, %arg7: memref<1x8x128xf32, #tpu.memory_space<vmem>>, %arg8: memref<8x128xf32, #tpu.memory_space<vmem>>, %arg9: memref<8x1xf32, #tpu.memory_space<vmem>>) attributes {dimension_semantics = [#tpu.dimension_semantics<parallel>, #tpu.dimension_semantics<parallel>, #tpu.dimension_semantics<parallel>, #tpu.dimension_semantics<arbitrary>], iteration_bounds = array<i64: 3, 1, 1, 1>, scalar_prefetch = 0 : i64, scratch_operands = 2 : i64, tpu.core_type = #tpu.core_type<tc>, window_params = [{transform_indices = @transform_0, window_bounds = array<i64: 1, 8, 32>}, {transform_indices = @transform_1, window_bounds = array<i64: 1, 32, 128>}, {transform_indices = @transform_2, window_bounds = array<i64: 1, 1, 128>}, {transform_indices = @transform_3, window_bounds = array<i64: 1, 8, 128>}]} {
    %c0_i32 = arith.constant 0 : i32
    %0 = arith.cmpi eq, %arg3, %c0_i32 : i32
    %1 = arith.extui %0 : i1 to i32
    %c0_i32_0 = arith.constant 0 : i32
    %2 = arith.cmpi ne, %1, %c0_i32_0 : i32
    scf.if %2 {
      %cst_17 = arith.constant 0.000000e+00 : f32
      %20 = vector.broadcast %cst_17 : f32 to vector<8x128xf32>
      %c0_18 = arith.constant 0 : index
      %c0_19 = arith.constant 0 : index
      %21 = vector.load %arg8[%c0_18, %c0_19] : memref<8x128xf32, #tpu.memory_space<vmem>>, vector<8x128xf32>
      tpu.vector_store %arg8[%c0_18, %c0_19], %20 {strides = array<i32>} : memref<8x128xf32, #tpu.memory_space<vmem>>, vector<8x128xf32>,
      %cst_20 = arith.constant 0.000000e+00 : f32
      %22 = vector.broadcast %cst_20 : f32 to vector<8x1xf32>
      %c0_21 = arith.constant 0 : index
      %c0_22 = arith.constant 0 : index
      %23 = vector.load %arg9[%c0_21, %c0_22] : memref<8x1xf32, #tpu.memory_space<vmem>>, vector<8x1xf32>
      tpu.vector_store %arg9[%c0_21, %c0_22], %22 {strides = array<i32>} : memref<8x1xf32, #tpu.memory_space<vmem>>, vector<8x1xf32>,
    } else {
    }
    %c0 = arith.constant 0 : index
    %c0_1 = arith.constant 0 : index
    %c0_2 = arith.constant 0 : index
    %3 = vector.load %arg4[%c0, %c0_1, %c0_2] : memref<1x8x32xf32, #tpu.memory_space<vmem>>, vector<1x8x32xf32>
    %4 = vector.shape_cast %3 : vector<1x8x32xf32> to vector<8x32xf32>
    %c0_3 = arith.constant 0 : index
    %c0_4 = arith.constant 0 : index
    %5 = vector.load %arg9[%c0_3, %c0_4] : memref<8x1xf32, #tpu.memory_space<vmem>>, vector<8x1xf32>
    %6 = arith.mulf %4, %4 : vector<8x32xf32>
    %cst = arith.constant dense<0.000000e+00> : vector<8xf32>
    %7 = vector.multi_reduction <add>, %6, %cst [1] : vector<8x32xf32> to vector<8xf32>
    %8 = vector.shape_cast %7 : vector<8xf32> to vector<8x1xf32>
    %9 = arith.addf %5, %8 : vector<8x1xf32>
    %c0_5 = arith.constant 0 : index
    %c0_6 = arith.constant 0 : index
    %10 = vector.load %arg9[%c0_5, %c0_6] : memref<8x1xf32, #tpu.memory_space<vmem>>, vector<8x1xf32>
    tpu.vector_store %arg9[%c0_5, %c0_6], %9 {strides = array<i32>} : memref<8x1xf32, #tpu.memory_space<vmem>>, vector<8x1xf32>,
    %c0_7 = arith.constant 0 : index
    %c0_8 = arith.constant 0 : index
    %11 = vector.load %arg8[%c0_7, %c0_8] : memref<8x128xf32, #tpu.memory_space<vmem>>, vector<8x128xf32>
    %c0_9 = arith.constant 0 : index
    %c0_10 = arith.constant 0 : index
    %c0_11 = arith.constant 0 : index
    %12 = vector.load %arg5[%c0_9, %c0_10, %c0_11] : memref<1x32x128xf32, #tpu.memory_space<vmem>>, vector<1x32x128xf32>
    %13 = vector.shape_cast %12 : vector<1x32x128xf32> to vector<32x128xf32>
    %cst_12 = arith.constant dense<0.000000e+00> : vector<8x128xf32>
    %14 = tpu.matmul %4, %13, %cst_12 {dimension_numbers = #tpu.dot_dimension_numbers<[1], [0], [0], [1], [0, 0, 1, 1], [], []>} : vector<8x32xf32>, vector<32x128xf32>, vector<8x128xf32> -> vector<8x128xf32>
    %15 = arith.addf %11, %14 : vector<8x128xf32>
    %c0_13 = arith.constant 0 : index
    %c0_14 = arith.constant 0 : index
    %16 = vector.load %arg8[%c0_13, %c0_14] : memref<8x128xf32, #tpu.memory_space<vmem>>, vector<8x128xf32>
    tpu.vector_store %arg8[%c0_13, %c0_14], %15 {strides = array<i32>} : memref<8x128xf32, #tpu.memory_space<vmem>>, vector<8x128xf32>,
    %c0_i32_15 = arith.constant 0 : i32
    %17 = arith.cmpi eq, %arg3, %c0_i32_15 : i32
    %18 = arith.extui %17 : i1 to i32
    %c0_i32_16 = arith.constant 0 : i32
    %19 = arith.cmpi ne, %18, %c0_i32_16 : i32
    scf.if %19 {
      %c0_17 = arith.constant 0 : index
      %c0_18 = arith.constant 0 : index
      %20 = vector.load %arg8[%c0_17, %c0_18] : memref<8x128xf32, #tpu.memory_space<vmem>>, vector<8x128xf32>
      %c0_19 = arith.constant 0 : index
      %c0_20 = arith.constant 0 : index
      %21 = vector.load %arg9[%c0_19, %c0_20] : memref<8x1xf32, #tpu.memory_space<vmem>>, vector<8x1xf32>
      %c0_21 = arith.constant 0 : index
      %c0_22 = arith.constant 0 : index
      %c0_23 = arith.constant 0 : index
      %22 = vector.load %arg6[%c0_21, %c0_22, %c0_23] : memref<1x1x128xf32, #tpu.memory_space<vmem>>, vector<1x1x128xf32>
      %23 = vector.shape_cast %22 : vector<1x1x128xf32> to vector<1x128xf32>
      %24 = vector.broadcast %21 : vector<8x1xf32> to vector<8x128xf32>
      %25 = vector.broadcast %23 : vector<1x128xf32> to vector<8x128xf32>
      %26 = arith.addf %24, %25 : vector<8x128xf32>
      %cst_24 = arith.constant 2.000000e+00 : f32
      %27 = vector.broadcast %cst_24 : f32 to vector<8x128xf32>
      %28 = arith.mulf %27, %20 : vector<8x128xf32>
      %29 = arith.subf %26, %28 : vector<8x128xf32>
      %cst_25 = arith.constant 0.000000e+00 : f32
      %30 = vector.broadcast %cst_25 : f32 to vector<8x128xf32>
      %31 = arith.maximumf %29, %30 : vector<8x128xf32>
      %32 = math.sqrt %31 : vector<8x128xf32>
      %c0_26 = arith.constant 0 : index
      %c0_27 = arith.constant 0 : index
      %c0_28 = arith.constant 0 : index
      %33 = vector.load %arg7[%c0_26, %c0_27, %c0_28] : memref<1x8x128xf32, #tpu.memory_space<vmem>>, vector<1x8x128xf32>
      %34 = vector.shape_cast %33 : vector<1x8x128xf32> to vector<8x128xf32>
      %35 = vector.shape_cast %32 : vector<8x128xf32> to vector<1x8x128xf32>
      tpu.vector_store %arg7[%c0_26, %c0_27, %c0_28], %35 {strides = array<i32>} : memref<1x8x128xf32, #tpu.memory_space<vmem>>, vector<1x8x128xf32>,
    } else {
    }
    return
  }
  func.func @transform_0(%arg0: i32, %arg1: i32, %arg2: i32, %arg3: i32) -> (i32, i32, i32) {
    %c0_i32 = arith.constant 0 : i32
    return %arg0, %arg1, %arg3 : i32, i32, i32
  }
  func.func @transform_1(%arg0: i32, %arg1: i32, %arg2: i32, %arg3: i32) -> (i32, i32, i32) {
    %c0_i32 = arith.constant 0 : i32
    return %arg0, %arg3, %arg2 : i32, i32, i32
  }
  func.func @transform_2(%arg0: i32, %arg1: i32, %arg2: i32, %arg3: i32) -> (i32, i32, i32) {
    %c0_i32 = arith.constant 0 : i32
    %c0_i32_0 = arith.constant 0 : i32
    return %arg0, %c0_i32, %arg2 : i32, i32, i32
  }
  func.func @transform_3(%arg0: i32, %arg1: i32, %arg2: i32, %arg3: i32) -> (i32, i32, i32) {
    %c0_i32 = arith.constant 0 : i32
    return %arg0, %arg1, %arg2 : i32, i32, i32
  }
}

</mosaic_0001>

<bundles_post_ra>
// kernel: tpu_custom_call.1
= control target key start
LH: loop header
LB: loop body
LE: loop exit
PB: predicated region body
PF: predicated region fallthrough
CT: control target
= control target key end

     0   :  { %8 = vsyncpa [#allocation5], 0  ;;  %s1024_s0 = inlined_call_operand.hbm [shape: f32[3,8,32], index: 0, kind: input, shape index: {}]   ;;  %s1025_s1 = inlined_call_operand.hbm [shape: f32[3,32,128], index: 1, kind: input, shape index: {}]   ;;  %s1026_s2 = inlined_call_operand.vmem [shape: f32[3,1,128], index: 2, kind: input, shape index: {}]   ;;  %s1027_s3 = inlined_call_operand.hbm [shape: f32[3,8,128], index: 3, kind: output, shape index: {}]  }
   0x1   :  { %10 = vsyncpa [#allocation5 + $0x1], 0 }
   0x2   :  { %11 = vsyncpa [#allocation8], 0 }
   0x3   :  { %13 = vsyncpa [#allocation8 + $0x1], 0 }
   0x4   :  { %14 = vsyncpa [#allocation6], 0 }
   0x5   :  { %16 = vsyncpa [#allocation6 + $0x1], 0  ;;  %s845_s12 = smov 0   ;;  %s847_s13 = smov 0  }
   0x6   :  { %s849_s14 = smov 0   ;;  %s851_s15 = smov 0  }
   0x7   :  { %s853_s16 = smov 0   ;;  %s855_s17 = smov 0  }
   0x8 LB: > { %s564_s18 = sadd.s32 4294967295, %s815_s17   ;;  %s565_s19 = sadd.s32 4294967294, %s815_s17   ;;  %s815_s17 = sphi %s855_s17, %s22_s17   ;;  %s811_s16 = sphi %s853_s16, %s1038_s16   ;;  %s807_s15 = sphi %s851_s15, %s1037_s15   ;;  %s803_s14 = sphi %s849_s14, %s1036_s14   ;;  %s799_s13 = sphi %s847_s13, %s1035_s13   ;;  %s795_s12 = sphi %s845_s12, %s1034_s12  }
   0x9   : > { %s48_s20 = sadd.s32 1, %s811_s16  ;;  %s59_s21 = sadd.s32 1, %s803_s14 }
   0xa   : > { %p50_p0 = scmp.ge.s32.totalorder %s48_s20, 3  ;;  %p66_p1 = scmp.ne.s32.totalorder %s803_s14, %s799_s13 }
   0xb   : > { %p67_p2 = scmp.eq.s32.totalorder %s815_s17, 0  ;;  %p72_p3 = scmp.ne.s32.totalorder %s799_s13, %s795_s12 }
   0xc   : > { %s1040_s20 = smov (%p50_p0, %s48_s20), 0  ;;  %p73_p5 = scmp.eq.s32.totalorder %s564_s18, 0 }
   0xd   : > { %p886_p4 = por %p67_p2, %p66_p1  ;;  %s52_s23 = ssub.s32 %s811_s16, %s1040_s20 }
   0xe   : > { %p158_p6 = scmp.eq.s32.totalorder %s564_s18, 2  ;;  %p57_p7 = scmp.eq.s32.totalorder %s52_s23, 0 }
   0xf   : > { %p892_p8 = por %p73_p5, %p72_p3  ;;  %p164_p10 = scmp.eq.s32.totalorder %s565_s19, 2 }
  0x10   : > { %p896_p9 = por %p158_p6, %p66_p1  ;;  %p617_p12 = scmp.lt.s32.totalorder %s815_s17, 3 }
  0x11   : > { %s901_s26 = scalar_select %p57_p7, %s803_s14, %s59_s21  }
  0x12   : > { %p903_p11 = por %p164_p10, %p72_p3  ;;  %s909_s28 = sand.u32 1, %s803_s14  }
  0x13   : > { %s568_s29 = sshll.u32 %s909_s28, 3  ;;  %s569_s30 = sshll.u32 %s811_s16, 7 }
  0x14   : > { %s195_s6 = scalar_lea.hbm %s1024_s0, %s569_s30  ;;  %s188_s7 = scalar_lea.vmem [#allocation4], %s568_s29 }
  0x15   : > { %s197_s8 = sshll.u32 %s188_s7, 4  ;;  %p918_p13 = pnand %p617_p12, %p886_p4  ;;  %s198_s8 = int_to_ptr.vmem [resolvable:$true] %s197_s8 }
  0x16   : > { %p573_p0 = scmp.ge.s32.totalorder %s815_s17, 1  ;;  %p235_p1 = scmp.lt.s32.totalorder %s815_s17, 4 }
  0x17   : > { %s185_s10 = scalar_lea.sflag [#allocation5], %s909_s28  ;;  %p677_p2 = pneg %p918_p13 }
  0x18   : > { %s688_s11 = scalar_lea.vmem %s198_s8, 128  ;;  %s817_s18 = smov [#allocation4]  }
  0x19   : > { %p689_p3 = scmp.ne.s32.totalorder %s198_s8, %s688_s11  ;;  %s693_s19 = sshll.u32 %s817_s18, 4  ;;  %s694_s19 = int_to_ptr.vmem [resolvable:$false] %s693_s19 }
  0x1a   : > { %s695_s21 = scalar_lea.vmem %s694_s19, 256  ;;  %p696_p4 = scmp.lt.s32.totalorder %s198_s8, %s694_s19 }
  0x1b   : > { %p691_p5 = pnand %p689_p3, %p677_p2  ;;  %p697_p7 = scmp.lt.s32.totalorder %s695_s21, %s688_s11 }
  0x1d   : > { %p692_p6 = pneg %p691_p5  ;;  %p698_p10 = por %p697_p7, %p696_p4 }
  0x1f   : > { %p699_p12 = pnand %p698_p10, %p692_p6 }
  0x21   : > { %702 = shalt.err (!%p699_p12)
}
  0x22   : > { %609 = dma.hbm_to_vmem [thread:$0]  (!%p918_p13), %s195_s6, 128, %s198_s8, %s185_s10  }
  0x23   : > { %p936_p3 = pnand %p573_p0, %p235_p1  ;;  %s570_s23 = sshll.u32 %s909_s28, 5 }
  0x24   : > { %s583_s29 = sshll.u32 %s811_s16, 9  ;;  %s208_s7 = scalar_lea.vmem [#allocation7], %s570_s23 }
  0x25   : > { %s217_s5 = scalar_lea.hbm %s1025_s1, %s583_s29  ;;  %s218_s11 = sshll.u32 %s208_s7, 4  ;;  %s219_s11 = int_to_ptr.vmem [resolvable:$true] %s218_s11 }
  0x26   : > { %s205_s18 = scalar_lea.sflag [#allocation8], %s909_s28  ;;  %s716_s19 = scalar_lea.vmem %s219_s11, 512 }
  0x27   : > { %p717_p5 = scmp.ne.s32.totalorder %s219_s11, %s716_s19  ;;  %s818_s6 = smov [#allocation7]  }
  0x28   : > { %s721_s8 = sshll.u32 %s818_s6, 4  ;;  %s722_s8 = int_to_ptr.vmem [resolvable:$false] %s721_s8 }
  0x29   : > { %p719_p6 = pnand %p717_p5, %p677_p2  ;;  %s723_s10 = scalar_lea.vmem %s722_s8, 1024 }
  0x2a   : > { %p724_p0 = scmp.lt.s32.totalorder %s219_s11, %s722_s8  ;;  %p725_p1 = scmp.lt.s32.totalorder %s723_s10, %s716_s19 }
  0x2b   : > { %p720_p4 = pneg %p719_p6 }
  0x2c   : > { %p726_p7 = por %p725_p1, %p724_p0 }
  0x2e   : > { %p727_p10 = pnand %p726_p7, %p720_p4 }
  0x30   : > { %730 = shalt.err (!%p727_p10)
}
  0x31   : > { %s819_s21 = smov 128   ;;  %s820_s23 = smov 8  }
  0x32   : > { %612 = dma.hbm_to_vmem [thread:$0]  (!%p918_p13), %s217_s5, 512, %s219_s11, %s205_s18, %s819_s21, %s819_s21, %s820_s23  }
  0x33   : > { %239 = sbr.rel (%p936_p3) target bundleno = 373 (0x175), region = 32  ;;  %s954_s28 = sand.u32 (!%p936_p3), 1, %s799_s13  }
  0x34   : > { %s574_s29 = sshll.u32 (!%p936_p3), %s954_s28, 3  ;;  %s242_s30 = scalar_lea.sflag (!%p936_p3), [#allocation5], %s954_s28 }
  0x35   : > { %s245_s4 = scalar_lea.vmem (!%p936_p3), [#allocation4], %s574_s29 }
  0x38   : > { %782 = dma.done.wait (%p892_p8), %s242_s30, 128  }
  0x39   : > { %784 = vsyncadd (%p892_p8), %s242_s30, 4294967168  ;;  %s575_s9 = sshll.u32 %s954_s28, 5  ;;  %s251_s22 = scalar_lea.sflag [#allocation8], %s954_s28 }
  0x3a   : > { %s254_s5 = scalar_lea.vmem [#allocation7], %s575_s9 }
  0x3b   : > { %786 = dma.done.wait (%p892_p8), %s251_s22, 512  }
  0x3c   : > { %788 = vsyncadd (%p892_p8), %s251_s22, 4294966784  ;;  %vm300_vm0 = vcmask 7168   ;;  %v821_v0 = vmov 0.0   ;;  %vm822_vm1 = vmmov 0   ;;  %v302_v1 = vld [vmem:[%s245_s4] sm:$0xff]  ;;  %vm305_vm2 = vcmask 261120  }
  0x3d   : > { %589 = vmatprep.subr.mxu0 %v821_v0  ;;  %597 = vmatprep.mubr.msk.f32.mxu0 %vm822_vm1, %v821_v0  ;;  %301 = vst.msk [vmem:[#allocation3] sm:$0xff] %vm300_vm0, %v821_v0  ;;  %v316_v2 = vld [vmem:[%s254_s5 + $0x18] sm:$0xff]  ;;  %v315_v3 = vld [vmem:[%s254_s5 + $0x10] sm:$0xff]  ;;  %v304_v4 = vmul.f32 %v302_v1, %v302_v1  ;;  %v314_v5 = vld [vmem:[%s254_s5 + $0x8] sm:$0xff]  ;;  %v823_v8 = vmov 0   ;;  %p289_p8 = scmp.lt.s32.totalorder %s807_s15, 2 }
  0x3e   : > { %590 = vmatpush3.msra.mxu0 %v316_v2  ;;  %v313_v7 = vld [vmem:[%s254_s5] sm:$0xff]  ;;  %672 = vset.pattern.permute.xlu0 %v823_v8  ;;  %s580_s19 = sshll.u32 %s807_s15, 7  ;;  %s287_s6 = scalar_lea.vmem [#allocation9], %s574_s29 }
  0x3f   : > { %591 = vmatprep.subr.mxu0 %v821_v0  ;;  %v306_v6 = vsel %vm305_vm2, %v304_v4, 0.0  ;;  %s290_s24 = scalar_select %p289_p8, %s807_s15, 2 }
  0x40   : > { %592 = vmatpush3.msra.mxu0 %v315_v3  ;;  %307 = vadd.xlane.f32.xlu0 %v306_v6  ;;  %s437_s8 = sshll.u32 %s287_s6, 4  ;;  %s983_s23 = scalar_lea.hbm %s1027_s3, %s580_s19  ;;  %s438_s8 = int_to_ptr.vmem [resolvable:$true] %s437_s8 }
  0x41   : > { %593 = vmatprep.subr.mxu0 %v821_v0  ;;  %s294_s18 = scalar_lea.vmem %s1026_s2, %s290_s24  ;;  %s422_s30 = scalar_lea.sflag [#allocation6], %s954_s28 }
  0x42   : > { %594 = vmatpush3.msra.mxu0 %v314_v5  ;;  %v578_v15 = vld [vmem:[%s294_s18] ss:$0 sm:$0xff]  ;;  %s731_s4 = scalar_lea.vmem %s438_s8, 128  ;;  %s824_s15 = smov [#allocation9]  }
  0x43   : > { %595 = vmatprep.subr.mxu0 %v821_v0  ;;  %p732_p13 = scmp.ne.s32.totalorder %s438_s8, %s731_s4  ;;  %s735_s29 = sshll.u32 %s824_s15, 4  ;;  %s736_s29 = int_to_ptr.vmem [resolvable:$false] %s735_s29 }
  0x44   : > { %596 = vmatpush3.msra.mxu0 %v313_v7  ;;  %v303_v9 = vld [vmem:[#allocation3] sm:$0xff]  ;;  %s737_s9 = scalar_lea.vmem %s736_s29, 256  ;;  %p738_p3 = scmp.lt.s32.totalorder %s438_s8, %s736_s29 }
  0x45   : > { %598 = vmatmul.mubr.msk.f32.vlgmr.msra.gmra.mxu0 %vm305_vm2, %v302_v1  ;;  %p733_p2 = pnand %p732_p13, %p896_p9  ;;  %p739_p5 = scmp.lt.s32.totalorder %s737_s9, %s731_s4 }
  0x47   : > { %p734_p12 = pneg %p733_p2  ;;  %p740_p6 = por %p739_p5, %p738_p3 }
  0x49   : > { %p741_p4 = pnand %p740_p6, %p734_p12 }
  0xc9   : > { %v308_v10 = vpop.xlane.xlu0 %307 }
  0xca   : > { %v309_v11 = vadd.f32 %v308_v10, %v303_v9 }
  0xcc   : > { %311 = vst.msk [vmem:[#allocation3] sm:$0xff] %vm300_vm0, %v309_v11 }
  0xd3   : > { %v396_v12 = vld [vmem:[#allocation3] sm:$0xff] }
  0xd4   : > { %400 = vperm.xlu0 %672, %v396_v12  }
 0x105   : > { %v386_v13 = vpop.f32.mrf.mxu0 }
 0x106   : > { %v410_v16 = vmul.f32 2.0, %v386_v13 }
 0x107   : > { %v599_v14 = vpop.f32.mrf.mxu0 }
 0x14f   : > { %v401_v17 = vpop.permute.xlu0 %400 }
 0x150   : > { %v409_v18 = vadd.f32 %v578_v15, %v401_v17 }
 0x152   : > { %v411_v19 = vsub.f32 %v409_v18, %v410_v16 }
 0x154   : > { %v412_v20 = vmax.f32 %v411_v19, 0.0 }
 0x156   : > { %673 = vrsqrt.f32 %v412_v20  ;;  %vm415_vm3 = vcmp.eq.f32.partialorder %v412_v20, inf  ;;  %v418_v23 = vand.u32 2147483648, %v412_v20  ;;  %vm417_vm4 = vcmp.eq.f32.partialorder %v412_v20, 0.0 }
 0x163   : > { %v674_v21 = vpop.eup %673 }
 0x164   : > { %v414_v22 = vmul.f32 %v674_v21, %v412_v20 }
 0x166   : > { %v416_v24 = vsel %vm415_vm3, %v412_v20, %v414_v22 }
 0x167   : > { %v419_v25 = vsel %vm417_vm4, %v418_v23, %v416_v24 }
 0x168   : > { %420 = vst [vmem:[%s287_s6] sm:$0xff] %v419_v25 }
 0x169   : > { %744 = shalt.err (!%p741_p4)
}
 0x16a   : > { %s745_s22 = scalar_lea.hbm %s983_s23, 128  ;;  %s749_s24 = scalar_lea.hbm %s1027_s3, 384 }
 0x16b   : > { %p746_p0 = scmp.ne.s32.totalorder %s983_s23, %s745_s22  ;;  %p750_p10 = scmp.lt.s32.totalorder %s983_s23, %s1027_s3 }
 0x16c   : > { %p751_p8 = scmp.lt.s32.totalorder %s749_s24, %s745_s22 }
 0x16d   : > { %p747_p1 = pnand %p746_p0, %p896_p9 }
 0x16e   : > { %p752_p13 = por %p751_p8, %p750_p10 }
 0x16f   : > { %p748_p7 = pneg %p747_p1 }
 0x171   : > { %p753_p2 = pnand %p752_p13, %p748_p7 }
 0x173   : > { %756 = shalt.err (!%p753_p2)
}
 0x174   : > { %604 = dma.vmem_to_hbm [thread:$0]  (%p896_p9), %s438_s8, 128, %s983_s23, %s422_s30  }
 0x175 PF: > { %p618_p12 = scmp.ge.s32.totalorder %s815_s17, 2  ;;  %s449_s18 = sand.u32 1, %s795_s12  }
 0x176   : > { %s450_s19 = scalar_lea.sflag [#allocation6], %s449_s18 }
 0x177   : > { %p614_p3 = pnand %p618_p12, %p903_p11 }
 0x179   : > { %p615_p5 = pneg %p614_p3 }
 0x17b   : > { %790 = dma.done.wait (%p615_p5), %s450_s19, 128  }
 0x17c   : > { %792 = vsyncadd (%p615_p5), %s450_s19, 4294967168  ;;  %s22_s17 = sadd.s32 1, %s815_s17   ;;  %s1034_s12 = smov %s799_s13 }
 0x17d   : > { %p19_p6 = scmp.ge.s32.totalorder %s22_s17, 5   ;;  %s1035_s13 = smov %s803_s14 }
 0x17e   : > { %s1036_s14 = smov %s901_s26  ;;  %s1037_s15 = smov %s811_s16 }
 0x17f   : > { %s1038_s16 = smov %s1040_s20  ;;  %21 = sbr.rel (!%p19_p6) target bundleno = 8 (0x8), region = 101 }
 0x184   :  { %455 = vsyncpa [#allocation5], 1 }
 0x185   :  { %457 = vsyncpa [#allocation5 + $0x1], 1 }
 0x186   :  { %458 = vsyncpa [#allocation8], 1 }
 0x187   :  { %460 = vsyncpa [#allocation8 + $0x1], 1 }
 0x188   :  { %461 = vsyncpa [#allocation6], 1 }
 0x189   :  { %463 = vsyncpa [#allocation6 + $0x1], 1 }

</bundles_post_ra>
